<compile_context>
chip_gen: v5e
topology: v5e:2x2
jax: 0.10.0
libtpu: 0.0.40
codegen_flags: <defaults>
</compile_context>

<pallas_src>
import jax
import jax.numpy as jnp
from jax import lax
from jax.experimental import pallas as pl
from jax.experimental.pallas import tpu as pltpu


_TARGET_TILE_BYTES = 4 * 1024 * 1024  # per output block (x2 double buffering):
                                      # fits v5e's 16 MiB scoped VMEM and v7x's 32 MiB.
_LANES = 128


def _i32(u: int) -> int:
    """Reinterpret an unsigned 32-bit constant as a signed int32 Python int."""
    return u - (1 << 32) if u >= (1 << 31) else u


_GOLDEN = _i32(0x9E3779B9)      # per-seed stream offset
_MIX1 = _i32(0x7FEB352D)        # lowbias32 multipliers
_MIX2 = _i32(0x846CA68B)
_ONE_F32_BITS = 0x3F800000      # bit pattern of 1.0f


def _make_rand_kernel(mant_bits: int, tile_r: int, lanes: int):
    sh_in = 32 - mant_bits      # keep only the top `mant_bits` random bits
    sh_out = 23 - mant_bits     # place them at the top of the f32 mantissa

    def kernel(seed_ref, o_ref):
        row0 = pl.program_id(0) * tile_r
        row = lax.broadcasted_iota(jnp.int32, (tile_r, lanes), 0) + row0
        col = lax.broadcasted_iota(jnp.int32, (tile_r, lanes), 1)
        # Global flat index in the (R_pad, lanes) slab -> stream independent of tiling.
        x = row * lanes + col
        # Mix in the seed, then a lowbias32-style hash. Pure int32 VPU ops:
        # no TPU-PRNG primitives, so this also lowers under interpret mode.
        x = x + (seed_ref[0] + 1) * jnp.int32(_GOLDEN)
        x = x ^ lax.shift_right_logical(x, 16)
        x = x * jnp.int32(_MIX1)
        x = x ^ lax.shift_right_logical(x, 15)
        x = x * jnp.int32(_MIX2)
        x = x ^ lax.shift_right_logical(x, 16)
        # Top `mant_bits` bits -> f32 in [1, 2) -> uniform in [0, 1). Using the
        # target dtype's precision makes the final cast exact (never hits 1.0).
        mant = lax.shift_right_logical(x, sh_in)
        if sh_out:
            mant = lax.shift_left(mant, sh_out)
        fbits = mant | jnp.int32(_ONE_F32_BITS)
        u = lax.bitcast_convert_type(fbits, jnp.float32) - jnp.float32(1.0)
        o_ref[...] = u.astype(o_ref.dtype)

    return kernel


def _round_up(a: int, b: int) -> int:
    return ((a + b - 1) // b) * b


def _sublane_multiple(dtype) -> int:
    return {4: 8, 2: 16, 1: 32}.get(jnp.dtype(dtype).itemsize, 8)


def random_like_pallas(x: jax.Array, seed: int = 0) -> jax.Array:
    """Equivalent of Random().forward(x): uniform [0, 1) of x's shape & dtype,
    with identical values along dim 0 (== torch.rand(1, *shape[1:]).expand_as(x))."""
    shape = x.shape
    dtype = x.dtype
    if not jnp.issubdtype(dtype, jnp.floating):
        raise TypeError(f"Random expects a floating dtype, got {dtype}")
    if x.ndim == 0:
        return random_like_pallas(x.reshape(1), seed).reshape(())
    if x.size == 0:
        return jnp.zeros(shape, dtype=dtype)

    inner = 1
    for d in shape[1:]:
        inner *= d  # == 1 for 1-D inputs: one value replicated, like torch

    itemsize = jnp.dtype(dtype).itemsize
    sub = _sublane_multiple(dtype)
    lanes = _LANES

    # Lane-dense (R_pad, 128) slab, padded so every block is full -> unmasked vst only.
    r_needed = pl.cdiv(inner, lanes)
    rows_budget = max((_TARGET_TILE_BYTES // (lanes * itemsize)) // sub * sub, sub)
    tile_r = min(_round_up(r_needed, sub), rows_budget)
    num_tiles = pl.cdiv(r_needed, tile_r)
    # v7x has 2 TensorCores: give the "parallel" axis >= 2 grid points whenever
    # there is enough sublane-aligned work to split.
    if num_tiles == 1 and r_needed > sub:
        tile_r = _round_up(pl.cdiv(r_needed, 2), sub)
        num_tiles = pl.cdiv(r_needed, tile_r)
    r_pad = num_tiles * tile_r

    mant_bits = min(int(jnp.finfo(dtype).nmant) + 1, 23)  # f32:23, bf16:8, f16:11
    kernel = _make_rand_kernel(mant_bits, tile_r, lanes)

    seed_arr = jnp.asarray([seed], dtype=jnp.int32)
    slab = pl.pallas_call(
        kernel,
        out_shape=jax.ShapeDtypeStruct((r_pad, lanes), dtype),
        grid_spec=pltpu.PrefetchScalarGridSpec(
            num_scalar_prefetch=1,
            grid=(num_tiles,),
            in_specs=[],  # x is never read: no tensor-input DMA at all
            out_specs=pl.BlockSpec((tile_r, lanes), lambda r, seed: (r, 0)),
        ),
        compiler_params=pltpu.CompilerParams(
            dimension_semantics=("parallel",),
        ),
    )(seed_arr)

    vals = slab.reshape(-1)[:inner].reshape(shape[1:])
    # expand_as semantics: replicate across dim 0 lazily instead of writing B
    # copies from the kernel (HBM write traffic drops by a factor of B).
    return jnp.broadcast_to(vals, shape)


if __name__ == "__main__":
    key = jax.random.PRNGKey(0)
    # NCHW input, small shape; only shape/dtype of x matter.
    x = jax.random.normal(key, (2, 4, 16, 16), dtype=jnp.float32)

    y = random_like_pallas(x, seed=0)
    jax.block_until_ready(y)

    assert y.shape == x.shape, (y.shape, x.shape)
    assert y.dtype == x.dtype, (y.dtype, x.dtype)
    # Uniform [0, 1)
    assert bool(jnp.all(y >= 0.0)) and bool(jnp.all(y < 1.0)), "values outside [0,1)"
    # Not a constant fill
    assert bool(jnp.max(y) != jnp.min(y)), "degenerate (constant) random output"
    # expand_as semantics: identical values across dim 0
    assert bool(jnp.array_equal(y[0], y[1])), "batch slices differ (expand semantics broken)"
    # Determinism for a fixed seed
    y2 = random_like_pallas(x, seed=0)
    jax.block_until_ready(y2)
    assert bool(jnp.array_equal(y, y2)), "not deterministic for a fixed seed"

    # bf16 dtype path: uniform built at bf16 precision -> strictly < 1.0
    xb = x.astype(jnp.bfloat16)
    yb = random_like_pallas(xb, seed=3)
    jax.block_until_ready(yb)
    assert yb.shape == xb.shape and yb.dtype == jnp.bfloat16
    assert bool(jnp.all(yb >= 0)) and bool(jnp.all(yb < 1))
    assert bool(jnp.array_equal(yb[0], yb[1]))
    assert bool(jnp.max(yb) != jnp.min(yb))

    print("KERNEL_OK")
</pallas_src>

<mosaic_0001>
module attributes {stable_mosaic.version = 11 : i64} {
  func.func @kernel(%arg0: i32, %arg1: memref<1xi32, #tpu.memory_space<smem>>, %arg2: memref<8x128xf32, #tpu.memory_space<vmem>>) attributes {dimension_semantics = [#tpu.dimension_semantics<parallel>], iteration_bounds = array<i64: 1>, scalar_prefetch = 1 : i64, scratch_operands = 0 : i64, tpu.core_type = #tpu.core_type<tc>, window_params = [{transform_indices = @transform_0, window_bounds = array<i64: 8, 128>}]} {
    %c8_i32 = arith.constant 8 : i32
    %0 = arith.muli %arg0, %c8_i32 : i32
    %1 = tpu.iota {dimensions = array<i32: 0>} : vector<8x128xi32>
    %2 = vector.broadcast %0 : i32 to vector<8x128xi32>
    %3 = arith.addi %1, %2 : vector<8x128xi32>
    %4 = tpu.iota {dimensions = array<i32: 1>} : vector<8x128xi32>
    %c128_i32 = arith.constant 128 : i32
    %5 = vector.broadcast %c128_i32 : i32 to vector<8x128xi32>
    %6 = arith.muli %3, %5 : vector<8x128xi32>
    %7 = arith.addi %6, %4 : vector<8x128xi32>
    %c0 = arith.constant 0 : index
    %8 = memref.load %arg1[%c0] : memref<1xi32, #tpu.memory_space<smem>>
    %c1_i32 = arith.constant 1 : i32
    %9 = arith.addi %8, %c1_i32 : i32
    %c-1640531527_i32 = arith.constant -1640531527 : i32
    %10 = arith.muli %9, %c-1640531527_i32 : i32
    %11 = vector.broadcast %10 : i32 to vector<8x128xi32>
    %12 = arith.addi %7, %11 : vector<8x128xi32>
    %c16_i32 = arith.constant 16 : i32
    %13 = vector.broadcast %c16_i32 : i32 to vector<8x128xi32>
    %14 = arith.shrui %12, %13 : vector<8x128xi32>
    %15 = arith.xori %12, %14 : vector<8x128xi32>
    %c2146121005_i32 = arith.constant 2146121005 : i32
    %16 = vector.broadcast %c2146121005_i32 : i32 to vector<8x128xi32>
    %17 = arith.muli %15, %16 : vector<8x128xi32>
    %c15_i32 = arith.constant 15 : i32
    %18 = vector.broadcast %c15_i32 : i32 to vector<8x128xi32>
    %19 = arith.shrui %17, %18 : vector<8x128xi32>
    %20 = arith.xori %17, %19 : vector<8x128xi32>
    %c-2073254261_i32 = arith.constant -2073254261 : i32
    %21 = vector.broadcast %c-2073254261_i32 : i32 to vector<8x128xi32>
    %22 = arith.muli %20, %21 : vector<8x128xi32>
    %c16_i32_0 = arith.constant 16 : i32
    %23 = vector.broadcast %c16_i32_0 : i32 to vector<8x128xi32>
    %24 = arith.shrui %22, %23 : vector<8x128xi32>
    %25 = arith.xori %22, %24 : vector<8x128xi32>
    %c9_i32 = arith.constant 9 : i32
    %26 = vector.broadcast %c9_i32 : i32 to vector<8x128xi32>
    %27 = arith.shrui %25, %26 : vector<8x128xi32>
    %c1065353216_i32 = arith.constant 1065353216 : i32
    %28 = vector.broadcast %c1065353216_i32 : i32 to vector<8x128xi32>
    %29 = arith.ori %27, %28 : vector<8x128xi32>
    %30 = tpu.bitcast %29 : vector<8x128xi32> -> vector<8x128xf32>
    %cst = arith.constant 1.000000e+00 : f32
    %31 = vector.broadcast %cst : f32 to vector<8x128xf32>
    %32 = arith.subf %30, %31 : vector<8x128xf32>
    %c0_1 = arith.constant 0 : index
    %c0_2 = arith.constant 0 : index
    %33 = vector.load %arg2[%c0_1, %c0_2] : memref<8x128xf32, #tpu.memory_space<vmem>>, vector<8x128xf32>
    tpu.vector_store %arg2[%c0_1, %c0_2], %32 {strides = array<i32>} : memref<8x128xf32, #tpu.memory_space<vmem>>, vector<8x128xf32>,
    return
  }
  func.func @transform_0(%arg0: i32, %arg1: memref<1xi32, #tpu.memory_space<smem>>) -> (i32, i32) {
    %c0_i32 = arith.constant 0 : i32
    %c0_i32_0 = arith.constant 0 : i32
    return %arg0, %c0_i32 : i32, i32
  }
}

</mosaic_0001>

<bundles_post_ra>
// kernel: tpu_custom_call.1
= control target key start
LH: loop header
LB: loop body
LE: loop exit
PB: predicated region body
PF: predicated region fallthrough
CT: control target
= control target key end

     0   :  { %v9_v0 = vlaneseq  ;;  %s96_s0 = inlined_call_operand.<no memory space> [shape: s32[1], index: 0, kind: input, shape index: {}]   ;;  %s97_s1 = inlined_call_operand.hbm [shape: f32[8,128], index: 1, kind: output, shape index: {}]  }
   0x1   :  { %s18_s8 = sadd.s32 1, %s96_s0 }
   0x2   :  { %7 = vsyncpa [#allocation5], 0  ;;  %s19_s9 = smul.u32 2654435769, %s18_s8  ;;  %v10_v1 = vshrl.u32 %v9_v0, 7  ;;  %v14_v2 = vand.u32 127, %v9_v0 }
   0x3   :  { %s79_s10 = smov [#allocation4]   ;;  %s42_s13 = sshll.u32 %s97_s1, 4  ;;  %s43_s13 = int_to_ptr.hbm [resolvable:$true] %s42_s13 }
   0x4   :  { %v15_v3 = vmul.u32 128, %v10_v1  ;;  %v20_v4 = vstv %s19_s9  ;;  %s40_s11 = sshll.u32 %s79_s10, 4  ;;  %s41_s11 = int_to_ptr.vmem [resolvable:$true] %s40_s11 }
   0x6   :  { %v16_v5 = vadd.s32 %v15_v3, %v14_v2 }
   0x8   :  { %v21_v6 = vadd.s32 %v20_v4, %v16_v5 }
   0xa   :  { %v22_v7 = vshrl.u32 %v21_v6, 16 }
   0xc   :  { %v23_v8 = vxor.u32 %v22_v7, %v21_v6 }
   0xe   :  { %v24_v9 = vmul.u32 2146121005, %v23_v8 }
  0x10   :  { %v25_v10 = vshrl.u32 %v24_v9, 15 }
  0x12   :  { %v26_v11 = vxor.u32 %v25_v10, %v24_v9 }
  0x14   :  { %v27_v12 = vmul.u32 2221713035, %v26_v11 }
  0x16   :  { %v28_v13 = vshrl.u32 %v27_v12, 16 }
  0x18   :  { %v29_v14 = vxor.u32 %v28_v13, %v27_v12 }
  0x1a   :  { %v30_v15 = vshrl.u32 %v29_v14, 9 }
  0x1c   :  { %v31_v16 = vor.u32 1065353216, %v30_v15 }
  0x1e   :  { %v51_v17 = vadd.f32 -1.0, %v31_v16 }
  0x20   :  { %34 = vst [vmem:[#allocation4] sm:$0xff] %v51_v17 }
  0x21   :  { %45 = dma.vmem_to_hbm [thread:$0]  %s41_s11, 128, %s43_s13, [#allocation5]  }
  0x22   :  { %77 = dma.done.wait [#allocation5], 128  }
  0x23   :  { %78 = vsyncadd [#allocation5], 4294967168 }
  0x24   :  { %50 = vsyncpa [#allocation5], 1 }

</bundles_post_ra>
